<compile_context>
chip_gen: v7x
topology: tpu7x:2x2x1
jax: 0.10.0
libtpu: 0.0.40
codegen_flags: <defaults>
</compile_context>

<pallas_src>
import jax
import jax.numpy as jnp
import numpy as np
from jax.experimental import pallas as pl
from jax.experimental.pallas import tpu as pltpu

# ---------------- config (mirrors the RMixer args) ----------------
N_AGENTS = 4
STATE_DIM = 32          # int(np.prod(args.state_shape))
EMBED_DIM = 32          # args.mixing_embed_dim
HYPERNET_EMBED = 64     # args.hypernet_embed  (hypernet_layers == 2)
NUM_ATOMS = 8           # args.num_atoms
BS = 2                  # batch
T = 8                   # timesteps
TB_DEFAULT = 256        # max flattened-batch tile (sweep 512/1024 for big B)

NA = N_AGENTS * NUM_ATOMS                  # 32 flattened dist lanes

# packed (B, 128) input slab lane offsets: [ s | dists | qs | pad ]
IN_W = 128
SOFF = 0                                   # state       (32 lanes)
DOFF = 32                                  # agent dists (32 lanes), DOFF % NUM_ATOMS == 0
QOFF = 64                                  # agent qs    (4 lanes)

L1_W = 3 * HYPERNET_EMBED + 2 * EMBED_DIM  # 256: fused layer-1 output width
L2_W = 256                                 # fused layer-2 output width (padded)
OUT_W = 128                                # lane-dense packed output width (== IN_W)

# fused layer-1 output column offsets == fused layer-2 input row offsets
R_HM = 0                                   # hyper_moq hidden      (64)
R_H1 = R_HM + HYPERNET_EMBED               # hyper_w_1 hidden      (64)
R_H2 = R_H1 + HYPERNET_EMBED               # hyper_w_final hidden  (64)
R_HV = R_H2 + HYPERNET_EMBED               # V hidden              (32)
R_B1 = R_HV + EMBED_DIM                    # hyper_b_1 output      (32, no relu)

# fused layer-2 output column offsets
C_W1 = 0                                   # |w1| flattened  (N_AGENTS*EMBED = 128)
C_MOQ = 128                                # |w_moq|         (N_AGENTS)
C_WF = 160                                 # |w_final|       (EMBED_DIM)
C_V = 192                                  # V output        (1, no abs)

MXU_DTYPE = jnp.bfloat16   # set to jnp.float32 for exact-precision parity


def _rmix_kernel(x_ref, w1_ref, b1_ref, w2_ref, b2_ref, o_ref):
    f32 = jnp.float32
    x = x_ref[...]                                   # (TB, 128): [ s | dists | qs | pad ]
    tb = x.shape[0]

    # ===== th.sort(agent_dists, dim=2): 6-stage Batcher odd-even merge sort =====
    # Dist lanes live at [DOFF, DOFF+NA); atom index = lane % NUM_ATOMS.  Partner
    # fetches are XLU lane rotations over the native 128-lane axis; the lo/hi
    # masks guarantee no lane ever uses a value rolled in from outside its own
    # agent's 8-atom group, so the cyclic wrap is harmless.  Non-dist lanes
    # (state / qs / pad) pass through unchanged.
    lane = jax.lax.broadcasted_iota(jnp.int32, (tb, IN_W), 1)
    in_d = (lane >= DOFF) & (lane < DOFF + NA)
    atom = lane % NUM_ATOMS
    a2 = atom % 2
    a4 = atom % 4
    stages = (
        # (distance d, lo-lane mask, hi-lane mask); comparator (a, a+d): lo<-min, hi<-max
        (1, a2 == 0, a2 == 1),                                       # (0,1)(2,3)(4,5)(6,7)
        (2, a4 <= 1, a4 >= 2),                                       # (0,2)(1,3)(4,6)(5,7)
        (1, a4 == 1, a4 == 2),                                       # (1,2)(5,6)
        (4, atom < 4, atom >= 4),                                    # (0,4)(1,5)(2,6)(3,7)
        (2, (atom == 2) | (atom == 3), (atom == 4) | (atom == 5)),   # (2,4)(3,5)
        (1, (a2 == 1) & (atom < 7), (a2 == 0) & (atom >= 2)),        # (1,2)(3,4)(5,6)
    )
    xs = x
    for d, lo, hi in stages:
        lo_m = lo & in_d
        hi_m = hi & in_d
        up = pltpu.roll(xs, IN_W - d, axis=1)        # value from lane + d
        dn = pltpu.roll(xs, d, axis=1)               # value from lane - d
        xs = jnp.where(lo_m, jnp.minimum(xs, up),
                       jnp.where(hi_m, jnp.maximum(xs, dn), xs))
    # xs: slab with each agent's 8 atoms sorted ascending in place.

    # ===== fused hypernets: two bf16 MXU matmuls (f32 accumulation) =====
    # Layer 1 consumes the raw slab; w1 rows outside the state lanes are zero.
    xb = x.astype(MXU_DTYPE)
    z1 = jnp.dot(xb, w1_ref[...], preferred_element_type=f32) + b1_ref[...]      # (TB, 256)
    h = jnp.maximum(z1, 0.0)                          # ReLU for all hypernet hiddens
    lin = z1[:, R_B1:R_B1 + EMBED_DIM]                # hyper_b_1 output (no ReLU), f32
    # TODO(synk): ActivateLayer is not defined in the reference source; treated as identity.
    z2 = jnp.dot(h.astype(MXU_DTYPE), w2_ref[...], preferred_element_type=f32) + b2_ref[...]

    w1_flat = jnp.abs(z2[:, C_W1:C_W1 + N_AGENTS * EMBED_DIM])   # (TB, 128)
    w_moq = jnp.abs(z2[:, C_MOQ:C_MOQ + N_AGENTS])               # (TB, 4)
    w_fin = jnp.abs(z2[:, C_WF:C_WF + EMBED_DIM])                # (TB, 32)
    v = z2[:, C_V:C_V + 1]                                       # (TB, 1)

    # ===== z_tot = bmm(normalized |w_moq|, sorted dists), built on the 128-lane slab =====
    # eps guard only matters for all-zero padded rows (avoids NaNs in discarded lanes).
    denom = jnp.maximum(jnp.sum(w_moq, axis=1, keepdims=True), 1e-30)
    weights = w_moq / denom                                            # (TB, 4)
    acc = jnp.zeros((tb, OUT_W), f32)
    for n in range(N_AGENTS):
        shift = (OUT_W - (DOFF + n * NUM_ATOMS)) % OUT_W   # agent n atoms -> lanes 0..7
        acc = acc + weights[:, n:n + 1] * pltpu.roll(xs, shift, axis=1)
    # lanes [0, NUM_ATOMS) of acc hold z_tot; higher lanes hold junk (masked below).

    # ===== q_tot: ELU(bmm(agent_qs, w1) + b1) . w_final + V(state) =====
    for n in range(N_AGENTS):
        lin = lin + x[:, QOFF + n:QOFF + n + 1] * w1_flat[:, n * EMBED_DIM:(n + 1) * EMBED_DIM]
    hidden = jnp.where(lin > 0, lin, jnp.exp(jnp.minimum(lin, 0.0)) - 1.0)        # ELU
    qtot = jnp.sum(hidden * w_fin, axis=1, keepdims=True) + v                     # (TB, 1)

    # ===== one unmasked full-width store: [ z_tot(8) | q_tot(1) | zeros ] =====
    o_ref[...] = jnp.where(lane < NUM_ATOMS, acc,
                           jnp.where(lane == NUM_ATOMS, qtot, 0.0))


# ---------------- host-side parameter packing (4 slabs instead of 18 refs) ----------------
def pack_params(p, mxu_dtype=MXU_DTYPE):
    f32 = jnp.float32
    w1c = jnp.zeros((IN_W, L1_W), f32)         # rows = slab lanes; only state rows non-zero
    b1c = jnp.zeros((1, L1_W), f32)
    for wk, bk, off, width in (
        ("w_mq1", "b_mq1", R_HM, HYPERNET_EMBED),
        ("w_h1a", "b_h1a", R_H1, HYPERNET_EMBED),
        ("w_wf1", "b_wf1", R_H2, HYPERNET_EMBED),
        ("w_v1", "b_v1", R_HV, EMBED_DIM),
        ("w_b1", "b_b1", R_B1, EMBED_DIM),
    ):
        w1c = w1c.at[SOFF:SOFF + STATE_DIM, off:off + width].set(p[wk].astype(f32))
        b1c = b1c.at[:, off:off + width].set(p[bk].astype(f32))

    w2c = jnp.zeros((L1_W, L2_W), f32)
    b2c = jnp.zeros((1, L2_W), f32)
    w2c = w2c.at[R_H1:R_H1 + HYPERNET_EMBED, C_W1:C_W1 + N_AGENTS * EMBED_DIM].set(p["w_h1b"])
    b2c = b2c.at[:, C_W1:C_W1 + N_AGENTS * EMBED_DIM].set(p["b_h1b"])
    w2c = w2c.at[R_HM:R_HM + HYPERNET_EMBED, C_MOQ:C_MOQ + N_AGENTS].set(p["w_mq2"])
    b2c = b2c.at[:, C_MOQ:C_MOQ + N_AGENTS].set(p["b_mq2"])
    w2c = w2c.at[R_H2:R_H2 + HYPERNET_EMBED, C_WF:C_WF + EMBED_DIM].set(p["w_wf2"])
    b2c = b2c.at[:, C_WF:C_WF + EMBED_DIM].set(p["b_wf2"])
    w2c = w2c.at[R_HV:R_HV + EMBED_DIM, C_V:C_V + 1].set(p["w_v2t"].T)
    b2c = b2c.at[:, C_V:C_V + 1].set(p["b_v2"])
    return w1c.astype(mxu_dtype), b1c, w2c.astype(mxu_dtype), b2c


def _cdiv(a, b):
    return -(-a // b)


def _round_up(x, m):
    return ((x + m - 1) // m) * m


def rmixer_forward(agent_qs, agent_dists, states, params, *, tb=None):
    """agent_qs: (bs,T,N), agent_dists: (bs,T,N,A), states: (bs,T,S)."""
    f32 = jnp.float32
    bs, t = agent_qs.shape[0], agent_qs.shape[1]
    B = bs * t

    # ---- pack one lane-dense (B, 128) input slab: [ s | dists | qs | pad ] ----
    s = states.reshape(B, STATE_DIM).astype(f32)
    d = agent_dists.reshape(B, NA).astype(f32)
    qs = agent_qs.reshape(B, N_AGENTS).astype(f32)
    pad = jnp.zeros((B, IN_W - (STATE_DIM + NA + N_AGENTS)), f32)
    slab = jnp.concatenate([s, d, qs, pad], axis=1)

    # ---- batch tile: clamp for small B; keep >= 2 blocks when possible (v7x: 2 TCs) ----
    if tb is None:
        tb = min(TB_DEFAULT, _round_up(B, 8))
        if B > 8 and _cdiv(B, tb) < 2:
            tb = _round_up(_cdiv(B, 2), 8)
    n_blocks = _cdiv(B, tb)
    b_pad = n_blocks * tb
    if b_pad != B:                          # zero-pad the remainder, never drop it
        slab = jnp.pad(slab, ((0, b_pad - B), (0, 0)))

    w1c, b1c, w2c, b2c = pack_params(params)

    out = pl.pallas_call(
        _rmix_kernel,
        out_shape=jax.ShapeDtypeStruct((b_pad, OUT_W), f32),
        grid=(n_blocks,),
        in_specs=[
            pl.BlockSpec((tb, IN_W), lambda i: (i, 0)),
            pl.BlockSpec((IN_W, L1_W), lambda i: (0, 0)),   # params: grid-invariant
            pl.BlockSpec((1, L1_W), lambda i: (0, 0)),
            pl.BlockSpec((L1_W, L2_W), lambda i: (0, 0)),
            pl.BlockSpec((1, L2_W), lambda i: (0, 0)),
        ],
        out_specs=pl.BlockSpec((tb, OUT_W), lambda i: (i, 0)),
        compiler_params=pltpu.CompilerParams(dimension_semantics=("parallel",)),
    )(slab, w1c, b1c, w2c, b2c)

    z_tot = out[:B, 0:NUM_ATOMS].reshape(bs, t, NUM_ATOMS)
    q_tot = out[:B, NUM_ATOMS:NUM_ATOMS + 1].reshape(bs, t, 1)
    return q_tot, z_tot


# ---------------- pure-JAX reference (mirrors the PyTorch forward) ----------------
def rmixer_ref(agent_qs, agent_dists, states, p):
    bs = agent_qs.shape[0]
    hp = jax.lax.Precision.HIGHEST
    relu = lambda z: jnp.maximum(z, 0.0)
    s = states.reshape(-1, STATE_DIM)
    qs = agent_qs.reshape(-1, 1, N_AGENTS)
    d = jnp.sort(agent_dists.reshape(-1, N_AGENTS, NUM_ATOMS), axis=2)

    hm = relu(jnp.dot(s, p["w_mq1"], precision=hp) + p["b_mq1"])
    w_moq = jnp.abs(jnp.dot(hm, p["w_mq2"], precision=hp) + p["b_mq2"]).reshape(-1, 1, N_AGENTS)
    weights = w_moq / jnp.sum(w_moq, axis=2, keepdims=True)
    z_tot = jnp.einsum("bij,bjk->bik", weights, d, precision=hp).reshape(bs, -1, NUM_ATOMS)

    h1 = relu(jnp.dot(s, p["w_h1a"], precision=hp) + p["b_h1a"])
    w1 = jnp.abs(jnp.dot(h1, p["w_h1b"], precision=hp) + p["b_h1b"]).reshape(-1, N_AGENTS, EMBED_DIM)
    b1 = (jnp.dot(s, p["w_b1"], precision=hp) + p["b_b1"]).reshape(-1, 1, EMBED_DIM)
    hidden = jax.nn.elu(jnp.einsum("bij,bjk->bik", qs, w1, precision=hp) + b1)

    h2 = relu(jnp.dot(s, p["w_wf1"], precision=hp) + p["b_wf1"])
    w_final = jnp.abs(jnp.dot(h2, p["w_wf2"], precision=hp) + p["b_wf2"]).reshape(-1, EMBED_DIM, 1)
    hv = relu(jnp.dot(s, p["w_v1"], precision=hp) + p["b_v1"])
    v = (jnp.dot(hv, p["w_v2t"].T, precision=hp) + p["b_v2"]).reshape(-1, 1, 1)
    y = jnp.einsum("bij,bjk->bik", hidden, w_final, precision=hp) + v
    q_tot = y.reshape(bs, -1, 1)
    return q_tot, z_tot


# ---------------- deterministic parameter init ----------------
def init_params(key):
    def lin(k, fan_in, fan_out):
        kw, kb = jax.random.split(k)
        bound = 1.0 / np.sqrt(fan_in)
        w = jax.random.uniform(kw, (fan_in, fan_out), jnp.float32, -bound, bound)
        b = jax.random.uniform(kb, (1, fan_out), jnp.float32, -bound, bound)
        return w, b

    keys = jax.random.split(key, 8)
    p = {}
    p["w_mq1"], p["b_mq1"] = lin(keys[0], STATE_DIM, HYPERNET_EMBED)
    p["w_mq2"], p["b_mq2"] = lin(keys[1], HYPERNET_EMBED, N_AGENTS)
    p["w_h1a"], p["b_h1a"] = lin(keys[2], STATE_DIM, HYPERNET_EMBED)
    p["w_h1b"], p["b_h1b"] = lin(keys[3], HYPERNET_EMBED, N_AGENTS * EMBED_DIM)
    p["w_b1"], p["b_b1"] = lin(keys[4], STATE_DIM, EMBED_DIM)
    p["w_wf1"], p["b_wf1"] = lin(keys[5], STATE_DIM, HYPERNET_EMBED)
    p["w_wf2"], p["b_wf2"] = lin(keys[6], HYPERNET_EMBED, EMBED_DIM)
    kv1, kv2 = jax.random.split(keys[7])
    p["w_v1"], p["b_v1"] = lin(kv1, STATE_DIM, EMBED_DIM)
    w_v2, b_v2 = lin(kv2, EMBED_DIM, 1)
    p["w_v2t"] = w_v2.T            # stored as (1, EMBED_DIM) row
    p["b_v2"] = b_v2               # (1, 1)
    return p


if __name__ == "__main__":
    key = jax.random.PRNGKey(0)
    kp, kq, kd, ks = jax.random.split(key, 4)
    params = init_params(kp)

    agent_qs = jax.random.normal(kq, (BS, T, N_AGENTS), jnp.float32)
    agent_dists = jax.random.normal(kd, (BS, T, N_AGENTS, NUM_ATOMS), jnp.float32)
    states = jax.random.normal(ks, (BS, T, STATE_DIM), jnp.float32)

    q_tot, z_tot = jax.jit(rmixer_forward)(agent_qs, agent_dists, states, params)
    jax.block_until_ready((q_tot, z_tot))

    q_ref, z_ref = rmixer_ref(agent_qs, agent_dists, states, params)
    # bf16 MXU operands (per perf review) introduce ~1e-2 drift vs the f32
    # HIGHEST-precision reference; the sort itself is bit-exact (roll-based).
    np.testing.assert_allclose(np.asarray(q_tot), np.asarray(q_ref), rtol=2e-2, atol=2e-2)
    np.testing.assert_allclose(np.asarray(z_tot), np.asarray(z_ref), rtol=2e-2, atol=2e-2)

    print("KERNEL_OK")
</pallas_src>

<mosaic_0001>
module attributes {stable_mosaic.version = 11 : i64} {
  func.func @_rmix_kernel(%arg0: i32, %arg1: memref<8x128xf32, #tpu.memory_space<vmem>>, %arg2: memref<128x256xbf16, #tpu.memory_space<vmem>>, %arg3: memref<1x256xf32, #tpu.memory_space<vmem>>, %arg4: memref<256x256xbf16, #tpu.memory_space<vmem>>, %arg5: memref<1x256xf32, #tpu.memory_space<vmem>>, %arg6: memref<8x128xf32, #tpu.memory_space<vmem>>) attributes {dimension_semantics = [#tpu.dimension_semantics<parallel>], iteration_bounds = array<i64: 2>, scalar_prefetch = 0 : i64, scratch_operands = 0 : i64, tpu.core_type = #tpu.core_type<tc>, window_params = [{transform_indices = @transform_0, window_bounds = array<i64: 8, 128>}, {pipeline_mode = #tpu.pipeline_mode<synchronous>, transform_indices = @transform_1, window_bounds = array<i64: 128, 256>}, {pipeline_mode = #tpu.pipeline_mode<synchronous>, transform_indices = @transform_2, window_bounds = array<i64: 1, 256>}, {pipeline_mode = #tpu.pipeline_mode<synchronous>, transform_indices = @transform_3, window_bounds = array<i64: 256, 256>}, {pipeline_mode = #tpu.pipeline_mode<synchronous>, transform_indices = @transform_4, window_bounds = array<i64: 1, 256>}, {transform_indices = @transform_5, window_bounds = array<i64: 8, 128>}]} {
    %c0 = arith.constant 0 : index
    %c0_0 = arith.constant 0 : index
    %0 = vector.load %arg1[%c0, %c0_0] : memref<8x128xf32, #tpu.memory_space<vmem>>, vector<8x128xf32>
    %1 = tpu.iota {dimensions = array<i32: 1>} : vector<8x128xi32>
    %c32_i32 = arith.constant 32 : i32
    %2 = vector.broadcast %c32_i32 : i32 to vector<8x128xi32>
    %3 = arith.cmpi sge, %1, %2 : vector<8x128xi32>
    %c64_i32 = arith.constant 64 : i32
    %4 = vector.broadcast %c64_i32 : i32 to vector<8x128xi32>
    %5 = arith.cmpi slt, %1, %4 : vector<8x128xi32>
    %6 = arith.andi %3, %5 : vector<8x128xi1>
    %c8_i32 = arith.constant 8 : i32
    %c0_i32 = arith.constant 0 : i32
    %7 = arith.cmpi eq, %c8_i32, %c0_i32 : i32
    %c1_i32 = arith.constant 1 : i32
    %8 = arith.select %7, %c1_i32, %c8_i32 : i32
    %9 = vector.broadcast %8 : i32 to vector<8x128xi32>
    %10 = arith.remsi %1, %9 : vector<8x128xi32>
    %c0_i32_1 = arith.constant 0 : i32
    %11 = vector.broadcast %c0_i32_1 : i32 to vector<8x128xi32>
    %12 = arith.cmpi ne, %10, %11 : vector<8x128xi32>
    %c0_i32_2 = arith.constant 0 : i32
    %13 = vector.broadcast %c0_i32_2 : i32 to vector<8x128xi32>
    %14 = arith.cmpi slt, %10, %13 : vector<8x128xi32>
    %c0_i32_3 = arith.constant 0 : i32
    %15 = arith.cmpi slt, %8, %c0_i32_3 : i32
    %16 = vector.broadcast %15 : i1 to vector<8x128xi1>
    %17 = vector.broadcast %16 : vector<8x128xi1> to vector<8x128xi1>
    %18 = arith.xori %14, %17 : vector<8x128xi1>
    %19 = arith.andi %18, %12 : vector<8x128xi1>
    %20 = vector.broadcast %8 : i32 to vector<8x128xi32>
    %21 = arith.addi %10, %20 : vector<8x128xi32>
    %22 = arith.select %19, %21, %10 : vector<8x128xi1>, vector<8x128xi32>
    %c2_i32 = arith.constant 2 : i32
    %c0_i32_4 = arith.constant 0 : i32
    %23 = arith.cmpi eq, %c2_i32, %c0_i32_4 : i32
    %c1_i32_5 = arith.constant 1 : i32
    %24 = arith.select %23, %c1_i32_5, %c2_i32 : i32
    %25 = vector.broadcast %24 : i32 to vector<8x128xi32>
    %26 = arith.remsi %22, %25 : vector<8x128xi32>
    %c0_i32_6 = arith.constant 0 : i32
    %27 = vector.broadcast %c0_i32_6 : i32 to vector<8x128xi32>
    %28 = arith.cmpi ne, %26, %27 : vector<8x128xi32>
    %c0_i32_7 = arith.constant 0 : i32
    %29 = vector.broadcast %c0_i32_7 : i32 to vector<8x128xi32>
    %30 = arith.cmpi slt, %26, %29 : vector<8x128xi32>
    %c0_i32_8 = arith.constant 0 : i32
    %31 = arith.cmpi slt, %24, %c0_i32_8 : i32
    %32 = vector.broadcast %31 : i1 to vector<8x128xi1>
    %33 = vector.broadcast %32 : vector<8x128xi1> to vector<8x128xi1>
    %34 = arith.xori %30, %33 : vector<8x128xi1>
    %35 = arith.andi %34, %28 : vector<8x128xi1>
    %36 = vector.broadcast %24 : i32 to vector<8x128xi32>
    %37 = arith.addi %26, %36 : vector<8x128xi32>
    %38 = arith.select %35, %37, %26 : vector<8x128xi1>, vector<8x128xi32>
    %c4_i32 = arith.constant 4 : i32
    %c0_i32_9 = arith.constant 0 : i32
    %39 = arith.cmpi eq, %c4_i32, %c0_i32_9 : i32
    %c1_i32_10 = arith.constant 1 : i32
    %40 = arith.select %39, %c1_i32_10, %c4_i32 : i32
    %41 = vector.broadcast %40 : i32 to vector<8x128xi32>
    %42 = arith.remsi %22, %41 : vector<8x128xi32>
    %c0_i32_11 = arith.constant 0 : i32
    %43 = vector.broadcast %c0_i32_11 : i32 to vector<8x128xi32>
    %44 = arith.cmpi ne, %42, %43 : vector<8x128xi32>
    %c0_i32_12 = arith.constant 0 : i32
    %45 = vector.broadcast %c0_i32_12 : i32 to vector<8x128xi32>
    %46 = arith.cmpi slt, %42, %45 : vector<8x128xi32>
    %c0_i32_13 = arith.constant 0 : i32
    %47 = arith.cmpi slt, %40, %c0_i32_13 : i32
    %48 = vector.broadcast %47 : i1 to vector<8x128xi1>
    %49 = vector.broadcast %48 : vector<8x128xi1> to vector<8x128xi1>
    %50 = arith.xori %46, %49 : vector<8x128xi1>
    %51 = arith.andi %50, %44 : vector<8x128xi1>
    %52 = vector.broadcast %40 : i32 to vector<8x128xi32>
    %53 = arith.addi %42, %52 : vector<8x128xi32>
    %54 = arith.select %51, %53, %42 : vector<8x128xi1>, vector<8x128xi32>
    %c0_i32_14 = arith.constant 0 : i32
    %55 = vector.broadcast %c0_i32_14 : i32 to vector<8x128xi32>
    %56 = arith.cmpi eq, %38, %55 : vector<8x128xi32>
    %c1_i32_15 = arith.constant 1 : i32
    %57 = vector.broadcast %c1_i32_15 : i32 to vector<8x128xi32>
    %58 = arith.cmpi eq, %38, %57 : vector<8x128xi32>
    %c1_i32_16 = arith.constant 1 : i32
    %59 = vector.broadcast %c1_i32_16 : i32 to vector<8x128xi32>
    %60 = arith.cmpi sle, %54, %59 : vector<8x128xi32>
    %c2_i32_17 = arith.constant 2 : i32
    %61 = vector.broadcast %c2_i32_17 : i32 to vector<8x128xi32>
    %62 = arith.cmpi sge, %54, %61 : vector<8x128xi32>
    %c1_i32_18 = arith.constant 1 : i32
    %63 = vector.broadcast %c1_i32_18 : i32 to vector<8x128xi32>
    %64 = arith.cmpi eq, %54, %63 : vector<8x128xi32>
    %c2_i32_19 = arith.constant 2 : i32
    %65 = vector.broadcast %c2_i32_19 : i32 to vector<8x128xi32>
    %66 = arith.cmpi eq, %54, %65 : vector<8x128xi32>
    %c4_i32_20 = arith.constant 4 : i32
    %67 = vector.broadcast %c4_i32_20 : i32 to vector<8x128xi32>
    %68 = arith.cmpi slt, %22, %67 : vector<8x128xi32>
    %c4_i32_21 = arith.constant 4 : i32
    %69 = vector.broadcast %c4_i32_21 : i32 to vector<8x128xi32>
    %70 = arith.cmpi sge, %22, %69 : vector<8x128xi32>
    %c2_i32_22 = arith.constant 2 : i32
    %71 = vector.broadcast %c2_i32_22 : i32 to vector<8x128xi32>
    %72 = arith.cmpi eq, %22, %71 : vector<8x128xi32>
    %c3_i32 = arith.constant 3 : i32
    %73 = vector.broadcast %c3_i32 : i32 to vector<8x128xi32>
    %74 = arith.cmpi eq, %22, %73 : vector<8x128xi32>
    %75 = arith.ori %72, %74 : vector<8x128xi1>
    %c4_i32_23 = arith.constant 4 : i32
    %76 = vector.broadcast %c4_i32_23 : i32 to vector<8x128xi32>
    %77 = arith.cmpi eq, %22, %76 : vector<8x128xi32>
    %c5_i32 = arith.constant 5 : i32
    %78 = vector.broadcast %c5_i32 : i32 to vector<8x128xi32>
    %79 = arith.cmpi eq, %22, %78 : vector<8x128xi32>
    %80 = arith.ori %77, %79 : vector<8x128xi1>
    %c1_i32_24 = arith.constant 1 : i32
    %81 = vector.broadcast %c1_i32_24 : i32 to vector<8x128xi32>
    %82 = arith.cmpi eq, %38, %81 : vector<8x128xi32>
    %c7_i32 = arith.constant 7 : i32
    %83 = vector.broadcast %c7_i32 : i32 to vector<8x128xi32>
    %84 = arith.cmpi slt, %22, %83 : vector<8x128xi32>
    %85 = arith.andi %82, %84 : vector<8x128xi1>
    %c0_i32_25 = arith.constant 0 : i32
    %86 = vector.broadcast %c0_i32_25 : i32 to vector<8x128xi32>
    %87 = arith.cmpi eq, %38, %86 : vector<8x128xi32>
    %c2_i32_26 = arith.constant 2 : i32
    %88 = vector.broadcast %c2_i32_26 : i32 to vector<8x128xi32>
    %89 = arith.cmpi sge, %22, %88 : vector<8x128xi32>
    %90 = arith.andi %87, %89 : vector<8x128xi1>
    %91 = arith.andi %56, %6 : vector<8x128xi1>
    %92 = arith.andi %58, %6 : vector<8x128xi1>
    %c127_i32 = arith.constant 127 : i32
    %93 = tpu.dynamic_rotate %0 by %c127_i32 dim 1 : vector<8x128xf32>, i32 -> vector<8x128xf32>
    %c1_i32_27 = arith.constant 1 : i32
    %94 = tpu.dynamic_rotate %0 by %c1_i32_27 dim 1 : vector<8x128xf32>, i32 -> vector<8x128xf32>
    %95 = arith.minimumf %0, %93 : vector<8x128xf32>
    %96 = arith.maximumf %0, %94 : vector<8x128xf32>
    %97 = arith.select %92, %96, %0 : vector<8x128xi1>, vector<8x128xf32>
    %98 = arith.select %91, %95, %97 : vector<8x128xi1>, vector<8x128xf32>
    %99 = arith.andi %60, %6 : vector<8x128xi1>
    %100 = arith.andi %62, %6 : vector<8x128xi1>
    %c126_i32 = arith.constant 126 : i32
    %101 = tpu.dynamic_rotate %98 by %c126_i32 dim 1 : vector<8x128xf32>, i32 -> vector<8x128xf32>
    %c2_i32_28 = arith.constant 2 : i32
    %102 = tpu.dynamic_rotate %98 by %c2_i32_28 dim 1 : vector<8x128xf32>, i32 -> vector<8x128xf32>
    %103 = arith.minimumf %98, %101 : vector<8x128xf32>
    %104 = arith.maximumf %98, %102 : vector<8x128xf32>
    %105 = arith.select %100, %104, %98 : vector<8x128xi1>, vector<8x128xf32>
    %106 = arith.select %99, %103, %105 : vector<8x128xi1>, vector<8x128xf32>
    %107 = arith.andi %64, %6 : vector<8x128xi1>
    %108 = arith.andi %66, %6 : vector<8x128xi1>
    %c127_i32_29 = arith.constant 127 : i32
    %109 = tpu.dynamic_rotate %106 by %c127_i32_29 dim 1 : vector<8x128xf32>, i32 -> vector<8x128xf32>
    %c1_i32_30 = arith.constant 1 : i32
    %110 = tpu.dynamic_rotate %106 by %c1_i32_30 dim 1 : vector<8x128xf32>, i32 -> vector<8x128xf32>
    %111 = arith.minimumf %106, %109 : vector<8x128xf32>
    %112 = arith.maximumf %106, %110 : vector<8x128xf32>
    %113 = arith.select %108, %112, %106 : vector<8x128xi1>, vector<8x128xf32>
    %114 = arith.select %107, %111, %113 : vector<8x128xi1>, vector<8x128xf32>
    %115 = arith.andi %68, %6 : vector<8x128xi1>
    %116 = arith.andi %70, %6 : vector<8x128xi1>
    %c124_i32 = arith.constant 124 : i32
    %117 = tpu.dynamic_rotate %114 by %c124_i32 dim 1 : vector<8x128xf32>, i32 -> vector<8x128xf32>
    %c4_i32_31 = arith.constant 4 : i32
    %118 = tpu.dynamic_rotate %114 by %c4_i32_31 dim 1 : vector<8x128xf32>, i32 -> vector<8x128xf32>
    %119 = arith.minimumf %114, %117 : vector<8x128xf32>
    %120 = arith.maximumf %114, %118 : vector<8x128xf32>
    %121 = arith.select %116, %120, %114 : vector<8x128xi1>, vector<8x128xf32>
    %122 = arith.select %115, %119, %121 : vector<8x128xi1>, vector<8x128xf32>
    %123 = arith.andi %75, %6 : vector<8x128xi1>
    %124 = arith.andi %80, %6 : vector<8x128xi1>
    %c126_i32_32 = arith.constant 126 : i32
    %125 = tpu.dynamic_rotate %122 by %c126_i32_32 dim 1 : vector<8x128xf32>, i32 -> vector<8x128xf32>
    %c2_i32_33 = arith.constant 2 : i32
    %126 = tpu.dynamic_rotate %122 by %c2_i32_33 dim 1 : vector<8x128xf32>, i32 -> vector<8x128xf32>
    %127 = arith.minimumf %122, %125 : vector<8x128xf32>
    %128 = arith.maximumf %122, %126 : vector<8x128xf32>
    %129 = arith.select %124, %128, %122 : vector<8x128xi1>, vector<8x128xf32>
    %130 = arith.select %123, %127, %129 : vector<8x128xi1>, vector<8x128xf32>
    %131 = arith.andi %85, %6 : vector<8x128xi1>
    %132 = arith.andi %90, %6 : vector<8x128xi1>
    %c127_i32_34 = arith.constant 127 : i32
    %133 = tpu.dynamic_rotate %130 by %c127_i32_34 dim 1 : vector<8x128xf32>, i32 -> vector<8x128xf32>
    %c1_i32_35 = arith.constant 1 : i32
    %134 = tpu.dynamic_rotate %130 by %c1_i32_35 dim 1 : vector<8x128xf32>, i32 -> vector<8x128xf32>
    %135 = arith.minimumf %130, %133 : vector<8x128xf32>
    %136 = arith.maximumf %130, %134 : vector<8x128xf32>
    %137 = arith.select %132, %136, %130 : vector<8x128xi1>, vector<8x128xf32>
    %138 = arith.select %131, %135, %137 : vector<8x128xi1>, vector<8x128xf32>
    %139 = arith.truncf %0 : vector<8x128xf32> to vector<8x128xbf16>
    %c0_36 = arith.constant 0 : index
    %c0_37 = arith.constant 0 : index
    %140 = vector.load %arg2[%c0_36, %c0_37] : memref<128x256xbf16, #tpu.memory_space<vmem>>, vector<128x256xbf16>
    %cst = arith.constant dense<0.000000e+00> : vector<8x256xf32>
    %141 = tpu.matmul %139, %140, %cst {dimension_numbers = #tpu.dot_dimension_numbers<[1], [0], [0], [1], [0, 0, 1, 1], [], []>} : vector<8x128xbf16>, vector<128x256xbf16>, vector<8x256xf32> -> vector<8x256xf32>
    %c0_38 = arith.constant 0 : index
    %c0_39 = arith.constant 0 : index
    %142 = vector.load %arg3[%c0_38, %c0_39] : memref<1x256xf32, #tpu.memory_space<vmem>>, vector<1x256xf32>
    %143 = vector.broadcast %142 : vector<1x256xf32> to vector<8x256xf32>
    %144 = arith.addf %141, %143 : vector<8x256xf32>
    %cst_40 = arith.constant 0.000000e+00 : f32
    %145 = vector.broadcast %cst_40 : f32 to vector<8x256xf32>
    %146 = arith.maximumf %144, %145 : vector<8x256xf32>
    %147 = vector.extract_strided_slice %144 {offsets = [0, 224], sizes = [8, 32], strides = [1, 1]} : vector<8x256xf32> to vector<8x32xf32>
    %148 = arith.truncf %146 : vector<8x256xf32> to vector<8x256xbf16>
    %c0_41 = arith.constant 0 : index
    %c0_42 = arith.constant 0 : index
    %149 = vector.load %arg4[%c0_41, %c0_42] : memref<256x256xbf16, #tpu.memory_space<vmem>>, vector<256x256xbf16>
    %cst_43 = arith.constant dense<0.000000e+00> : vector<8x256xf32>
    %150 = tpu.matmul %148, %149, %cst_43 {dimension_numbers = #tpu.dot_dimension_numbers<[1], [0], [0], [1], [0, 0, 1, 1], [], []>} : vector<8x256xbf16>, vector<256x256xbf16>, vector<8x256xf32> -> vector<8x256xf32>
    %c0_44 = arith.constant 0 : index
    %c0_45 = arith.constant 0 : index
    %151 = vector.load %arg5[%c0_44, %c0_45] : memref<1x256xf32, #tpu.memory_space<vmem>>, vector<1x256xf32>
    %152 = vector.broadcast %151 : vector<1x256xf32> to vector<8x256xf32>
    %153 = arith.addf %150, %152 : vector<8x256xf32>
    %154 = vector.extract_strided_slice %153 {offsets = [0, 0], sizes = [8, 128], strides = [1, 1]} : vector<8x256xf32> to vector<8x128xf32>
    %155 = math.absf %154 : vector<8x128xf32>
    %156 = vector.extract_strided_slice %153 {offsets = [0, 128], sizes = [8, 4], strides = [1, 1]} : vector<8x256xf32> to vector<8x4xf32>
    %157 = math.absf %156 : vector<8x4xf32>
    %158 = vector.extract_strided_slice %153 {offsets = [0, 160], sizes = [8, 32], strides = [1, 1]} : vector<8x256xf32> to vector<8x32xf32>
    %159 = math.absf %158 : vector<8x32xf32>
    %160 = vector.extract_strided_slice %153 {offsets = [0, 192], sizes = [8, 1], strides = [1, 1]} : vector<8x256xf32> to vector<8x1xf32>
    %cst_46 = arith.constant dense<0.000000e+00> : vector<8xf32>
    %161 = vector.multi_reduction <add>, %157, %cst_46 [1] : vector<8x4xf32> to vector<8xf32>
    %162 = vector.shape_cast %161 : vector<8xf32> to vector<8x1xf32>
    %cst_47 = arith.constant 1.000000e-30 : f32
    %163 = vector.broadcast %cst_47 : f32 to vector<8x1xf32>
    %164 = arith.maximumf %162, %163 : vector<8x1xf32>
    %165 = vector.broadcast %164 : vector<8x1xf32> to vector<8x4xf32>
    %166 = arith.divf %157, %165 : vector<8x4xf32>
    %cst_48 = arith.constant 0.000000e+00 : f32
    %167 = vector.broadcast %cst_48 : f32 to vector<8x128xf32>
    %168 = vector.extract_strided_slice %166 {offsets = [0, 0], sizes = [8, 1], strides = [1, 1]} : vector<8x4xf32> to vector<8x1xf32>
    %c96_i32 = arith.constant 96 : i32
    %169 = tpu.dynamic_rotate %138 by %c96_i32 dim 1 : vector<8x128xf32>, i32 -> vector<8x128xf32>
    %170 = vector.broadcast %168 : vector<8x1xf32> to vector<8x128xf32>
    %171 = arith.mulf %170, %169 : vector<8x128xf32>
    %172 = arith.addf %167, %171 : vector<8x128xf32>
    %173 = vector.extract_strided_slice %166 {offsets = [0, 1], sizes = [8, 1], strides = [1, 1]} : vector<8x4xf32> to vector<8x1xf32>
    %c88_i32 = arith.constant 88 : i32
    %174 = tpu.dynamic_rotate %138 by %c88_i32 dim 1 : vector<8x128xf32>, i32 -> vector<8x128xf32>
    %175 = vector.broadcast %173 : vector<8x1xf32> to vector<8x128xf32>
    %176 = arith.mulf %175, %174 : vector<8x128xf32>
    %177 = arith.addf %172, %176 : vector<8x128xf32>
    %178 = vector.extract_strided_slice %166 {offsets = [0, 2], sizes = [8, 1], strides = [1, 1]} : vector<8x4xf32> to vector<8x1xf32>
    %c80_i32 = arith.constant 80 : i32
    %179 = tpu.dynamic_rotate %138 by %c80_i32 dim 1 : vector<8x128xf32>, i32 -> vector<8x128xf32>
    %180 = vector.broadcast %178 : vector<8x1xf32> to vector<8x128xf32>
    %181 = arith.mulf %180, %179 : vector<8x128xf32>
    %182 = arith.addf %177, %181 : vector<8x128xf32>
    %183 = vector.extract_strided_slice %166 {offsets = [0, 3], sizes = [8, 1], strides = [1, 1]} : vector<8x4xf32> to vector<8x1xf32>
    %c72_i32 = arith.constant 72 : i32
    %184 = tpu.dynamic_rotate %138 by %c72_i32 dim 1 : vector<8x128xf32>, i32 -> vector<8x128xf32>
    %185 = vector.broadcast %183 : vector<8x1xf32> to vector<8x128xf32>
    %186 = arith.mulf %185, %184 : vector<8x128xf32>
    %187 = arith.addf %182, %186 : vector<8x128xf32>
    %188 = vector.extract_strided_slice %0 {offsets = [0, 64], sizes = [8, 1], strides = [1, 1]} : vector<8x128xf32> to vector<8x1xf32>
    %189 = vector.extract_strided_slice %155 {offsets = [0, 0], sizes = [8, 32], strides = [1, 1]} : vector<8x128xf32> to vector<8x32xf32>
    %190 = vector.broadcast %188 : vector<8x1xf32> to vector<8x32xf32>
    %191 = arith.mulf %190, %189 : vector<8x32xf32>
    %192 = arith.addf %147, %191 : vector<8x32xf32>
    %193 = vector.extract_strided_slice %0 {offsets = [0, 65], sizes = [8, 1], strides = [1, 1]} : vector<8x128xf32> to vector<8x1xf32>
    %194 = vector.extract_strided_slice %155 {offsets = [0, 32], sizes = [8, 32], strides = [1, 1]} : vector<8x128xf32> to vector<8x32xf32>
    %195 = vector.broadcast %193 : vector<8x1xf32> to vector<8x32xf32>
    %196 = arith.mulf %195, %194 : vector<8x32xf32>
    %197 = arith.addf %192, %196 : vector<8x32xf32>
    %198 = vector.extract_strided_slice %0 {offsets = [0, 66], sizes = [8, 1], strides = [1, 1]} : vector<8x128xf32> to vector<8x1xf32>
    %199 = vector.extract_strided_slice %155 {offsets = [0, 64], sizes = [8, 32], strides = [1, 1]} : vector<8x128xf32> to vector<8x32xf32>
    %200 = vector.broadcast %198 : vector<8x1xf32> to vector<8x32xf32>
    %201 = arith.mulf %200, %199 : vector<8x32xf32>
    %202 = arith.addf %197, %201 : vector<8x32xf32>
    %203 = vector.extract_strided_slice %0 {offsets = [0, 67], sizes = [8, 1], strides = [1, 1]} : vector<8x128xf32> to vector<8x1xf32>
    %204 = vector.extract_strided_slice %155 {offsets = [0, 96], sizes = [8, 32], strides = [1, 1]} : vector<8x128xf32> to vector<8x32xf32>
    %205 = vector.broadcast %203 : vector<8x1xf32> to vector<8x32xf32>
    %206 = arith.mulf %205, %204 : vector<8x32xf32>
    %207 = arith.addf %202, %206 : vector<8x32xf32>
    %cst_49 = arith.constant 0.000000e+00 : f32
    %208 = vector.broadcast %cst_49 : f32 to vector<8x32xf32>
    %209 = arith.cmpf ogt, %207, %208 : vector<8x32xf32>
    %cst_50 = arith.constant 0.000000e+00 : f32
    %210 = vector.broadcast %cst_50 : f32 to vector<8x32xf32>
    %211 = arith.minimumf %207, %210 : vector<8x32xf32>
    %212 = math.exp %211 : vector<8x32xf32>
    %cst_51 = arith.constant 1.000000e+00 : f32
    %213 = vector.broadcast %cst_51 : f32 to vector<8x32xf32>
    %214 = arith.subf %212, %213 : vector<8x32xf32>
    %215 = arith.select %209, %207, %214 : vector<8x32xi1>, vector<8x32xf32>
    %216 = arith.mulf %215, %159 : vector<8x32xf32>
    %cst_52 = arith.constant dense<0.000000e+00> : vector<8xf32>
    %217 = vector.multi_reduction <add>, %216, %cst_52 [1] : vector<8x32xf32> to vector<8xf32>
    %218 = vector.shape_cast %217 : vector<8xf32> to vector<8x1xf32>
    %219 = arith.addf %218, %160 : vector<8x1xf32>
    %c8_i32_53 = arith.constant 8 : i32
    %220 = vector.broadcast %c8_i32_53 : i32 to vector<8x128xi32>
    %221 = arith.cmpi slt, %1, %220 : vector<8x128xi32>
    %c8_i32_54 = arith.constant 8 : i32
    %222 = vector.broadcast %c8_i32_54 : i32 to vector<8x128xi32>
    %223 = arith.cmpi eq, %1, %222 : vector<8x128xi32>
    %cst_55 = arith.constant 0.000000e+00 : f32
    %224 = vector.shape_cast %219 : vector<8x1xf32> to vector<8x1xf32>
    %225 = vector.broadcast %224 : vector<8x1xf32> to vector<8x128xf32>
    %226 = vector.broadcast %cst_55 : f32 to vector<8x128xf32>
    %227 = arith.select %223, %225, %226 : vector<8x128xi1>, vector<8x128xf32>
    %228 = arith.select %221, %187, %227 : vector<8x128xi1>, vector<8x128xf32>
    %c0_56 = arith.constant 0 : index
    %c0_57 = arith.constant 0 : index
    %229 = vector.load %arg6[%c0_56, %c0_57] : memref<8x128xf32, #tpu.memory_space<vmem>>, vector<8x128xf32>
    tpu.vector_store %arg6[%c0_56, %c0_57], %228 {strides = array<i32>} : memref<8x128xf32, #tpu.memory_space<vmem>>, vector<8x128xf32>,
    return
  }
  func.func @transform_0(%arg0: i32) -> (i32, i32) {
    %c0_i32 = arith.constant 0 : i32
    %c0_i32_0 = arith.constant 0 : i32
    return %arg0, %c0_i32 : i32, i32
  }
  func.func @transform_1(%arg0: i32) -> (i32, i32) {
    %c0_i32 = arith.constant 0 : i32
    %c0_i32_0 = arith.constant 0 : i32
    %c0_i32_1 = arith.constant 0 : i32
    return %c0_i32, %c0_i32_0 : i32, i32
  }
  func.func @transform_2(%arg0: i32) -> (i32, i32) {
    %c0_i32 = arith.constant 0 : i32
    %c0_i32_0 = arith.constant 0 : i32
    %c0_i32_1 = arith.constant 0 : i32
    return %c0_i32, %c0_i32_0 : i32, i32
  }
  func.func @transform_3(%arg0: i32) -> (i32, i32) {
    %c0_i32 = arith.constant 0 : i32
    %c0_i32_0 = arith.constant 0 : i32
    %c0_i32_1 = arith.constant 0 : i32
    return %c0_i32, %c0_i32_0 : i32, i32
  }
  func.func @transform_4(%arg0: i32) -> (i32, i32) {
    %c0_i32 = arith.constant 0 : i32
    %c0_i32_0 = arith.constant 0 : i32
    %c0_i32_1 = arith.constant 0 : i32
    return %c0_i32, %c0_i32_0 : i32, i32
  }
  func.func @transform_5(%arg0: i32) -> (i32, i32) {
    %c0_i32 = arith.constant 0 : i32
    %c0_i32_0 = arith.constant 0 : i32
    return %arg0, %c0_i32 : i32, i32
  }
}

</mosaic_0001>

<bundles_post_ra>
// kernel: rmixer_forward.1
= control target key start
LH: loop header
LB: loop body
LE: loop exit
PB: predicated region body
PF: predicated region fallthrough
CT: control target
= control target key end

     0   :  { %s1131_s18 = smov 0   ;;  %s1408_s0 = inlined_call_operand.vmem [shape: f32[16,128], index: 0, kind: input, shape index: {}]   ;;  %s1409_s1 = inlined_call_operand.vmem [shape: bf16[128,256], index: 1, kind: input, shape index: {}]   ;;  %s1410_s2 = inlined_call_operand.vmem [shape: f32[1,256], index: 2, kind: input, shape index: {}]   ;;  %s1411_s3 = inlined_call_operand.vmem [shape: bf16[256,256], index: 3, kind: input, shape index: {}]   ;;  %s1412_s4 = inlined_call_operand.vmem [shape: f32[1,256], index: 4, kind: input, shape index: {}]   ;;  %s1413_s5 = inlined_call_operand.vmem [shape: f32[16,128], index: 5, kind: output, shape index: {}]  }
   0x1 LB: > { %s902_s19 = sadd.s32 4294967295, %s1079_s18   ;;  %p906_p0 = scmp.ge.s32.totalorder %s1079_s18, 1  ;;  %s1079_s18 = sphi %s1131_s18, %s15_s18  }
   0x2   : > { %p186_p1 = scmp.lt.s32.totalorder %s1079_s18, 3 }
   0x4   : > { %p187_p2 = pnand %p906_p0, %p186_p1 }
   0x5   : > { %v997_v0 = vld [vmem:[%s1409_s1 + $0x4] ss:$8 sps:$4 sm:$0xff] (!%p187_p2)   ;;  %p212_p3 = scmp.lt.s32.totalorder (!%p187_p2), %s902_s19, 1  ;;  %v999_v1 = vld [vmem:[%s1409_s1] ss:$8 sps:$4 sm:$0xff] (!%p187_p2)   ;;  %v1081_v3 = vmov (!%p187_p2), 0   ;;  %v222_v48 = vlaneseq (!%p187_p2) }
   0x6   : > { %190 = sbr.rel (%p187_p2) target bundleno = 1022 (0x3fe), region = 40  ;;  %450 = vmatprep.subr.bf16.mxu0 (!%p187_p2), %v997_v0  ;;  %v1000_v2 = vld [vmem:[%s1409_s1 + $0x14] ss:$8 sps:$4 sm:$0xff] (!%p187_p2)   ;;  %482 = vmatprep.mubr.bf16.mxu0 (!%p187_p2), %v1081_v3  ;;  %v1002_v4 = vld [vmem:[%s1409_s1 + $0x10] ss:$8 sps:$4 sm:$0xff] (!%p187_p2)   ;;  %s1082_s9 = smov (!%p187_p2), 1  }
   0x7   : > { %451 = vmatpush1.bf16.msra.mxu0 (!%p187_p2), %v999_v1  ;;  %v1003_v5 = vld [vmem:[%s1409_s1 + $0x24] ss:$8 sps:$4 sm:$0xff] (!%p187_p2)   ;;  %v1005_v7 = vld [vmem:[%s1409_s1 + $0x20] ss:$8 sps:$4 sm:$0xff] (!%p187_p2)   ;;  %v1006_v8 = vld [vmem:[%s1409_s1 + $0x34] ss:$8 sps:$4 sm:$0xff] (!%p187_p2)  }
   0x8   : > { %452 = vmatprep.subr.bf16.mxu0 (!%p187_p2), %v1000_v2  ;;  %v1083_v9 = vmov (!%p187_p2), 65   ;;  %v1084_v10 = vmov (!%p187_p2), 64   ;;  %s1085_s14 = smov (!%p187_p2), 127   ;;  %v1008_v11 = vld [vmem:[%s1409_s1 + $0x30] ss:$8 sps:$4 sm:$0xff] (!%p187_p2)   ;;  %v1287_v49 = vand.u32 (!%p187_p2), 127, %v222_v48 }
   0x9   : > { %989 = vset.pattern.permute.xlu1 (!%p187_p2), %v1083_v9  ;;  %988 = vset.pattern.permute.xlu0 (!%p187_p2), %v1084_v10  ;;  %v1009_v12 = vld [vmem:[%s1409_s1 + $0x44] ss:$8 sps:$4 sm:$0xff] (!%p187_p2)   ;;  %v1023_v14 = vld [vmem:[%s1411_s3] ss:$8 sps:$4 sm:$0xff] (!%p187_p2)   ;;  %v1024_v16 = vld [vmem:[%s1411_s3 + $0x14] ss:$8 sps:$4 sm:$0xff] (!%p187_p2)  }
   0xa   : > { %v1021_v13 = vld [vmem:[%s1411_s3 + $0x4] ss:$8 sps:$4 sm:$0xff] (!%p187_p2)   ;;  %v1011_v15 = vld [vmem:[%s1409_s1 + $0x40] ss:$8 sps:$4 sm:$0xff] (!%p187_p2)   ;;  %v1012_v17 = vld [vmem:[%s1409_s1 + $0x54] ss:$8 sps:$4 sm:$0xff] (!%p187_p2)  }
   0xb   : > { %453 = vmatpush1.bf16.msra.mxu0 (!%p187_p2), %v1002_v4  ;;  %699 = vmatprep.subr.bf16.mxu1 (!%p187_p2), %v1021_v13  ;;  %v1026_v18 = vld [vmem:[%s1411_s3 + $0x10] ss:$8 sps:$4 sm:$0xff] (!%p187_p2)   ;;  %v1027_v19 = vld [vmem:[%s1411_s3 + $0x24] ss:$8 sps:$4 sm:$0xff] (!%p187_p2)   ;;  %v1029_v22 = vld [vmem:[%s1411_s3 + $0x20] ss:$8 sps:$4 sm:$0xff] (!%p187_p2)  }
   0xc   : > { %454 = vmatprep.subr.bf16.mxu0 (!%p187_p2), %v1003_v5  ;;  %700 = vmatpush1.bf16.msra.mxu1 (!%p187_p2), %v1023_v14  ;;  %v1014_v20 = vld [vmem:[%s1409_s1 + $0x50] ss:$8 sps:$4 sm:$0xff] (!%p187_p2)   ;;  %v1015_v21 = vld [vmem:[%s1409_s1 + $0x64] ss:$8 sps:$4 sm:$0xff] (!%p187_p2)   ;;  %v1030_v23 = vld [vmem:[%s1411_s3 + $0x34] ss:$8 sps:$4 sm:$0xff] (!%p187_p2)  }
   0xd   : > { %s1421_s19 = smov (!%p212_p3, %s902_s19), 1  ;;  %701 = vmatprep.subr.bf16.mxu1 %v1024_v16  ;;  %v1017_v24 = vld [vmem:[%s1409_s1 + $0x60] ss:$8 sps:$4 sm:$0xff]   ;;  %v1018_v25 = vld [vmem:[%s1409_s1 + $0x74] ss:$8 sps:$4 sm:$0xff]   ;;  %v1290_v50 = vand.u32 7, %v1287_v49 }
   0xe   : > { %s907_s28 = sshll.u32 %s1421_s19, 3  ;;  %v1032_v26 = vld [vmem:[%s1411_s3 + $0x30] ss:$8 sps:$4 sm:$0xff]   ;;  %v1033_v27 = vld [vmem:[%s1411_s3 + $0x44] ss:$8 sps:$4 sm:$0xff]   ;;  %vm224_vm0 = vcmp.ge.s32.totalorder %v1287_v49, 32 }
   0xf   : > { %s215_s8 = scalar_lea.vmem %s1408_s0, %s907_s28  ;;  %455 = vmatpush1.bf16.msra.mxu0 %v1005_v7  ;;  %v1020_v28 = vld [vmem:[%s1409_s1 + $0x70] ss:$8 sps:$4 sm:$0xff]   ;;  %v1035_v29 = vld [vmem:[%s1411_s3 + $0x40] ss:$8 sps:$4 sm:$0xff]   ;;  %v1036_v30 = vld [vmem:[%s1411_s3 + $0x54] ss:$8 sps:$4 sm:$0xff]   ;;  %s219_s10 = scalar_lea.vmem %s1413_s5, %s907_s28 }
  0x10   : > { %v1163_v6 = vld [vmem:[%s215_s8] sm:$0xff]  ;;  %456 = vmatprep.subr.bf16.mxu0 %v1006_v8  ;;  %702 = vmatpush1.bf16.msra.mxu1 %v1026_v18  ;;  %v1038_v32 = vld [vmem:[%s1411_s3 + $0x50] ss:$8 sps:$4 sm:$0xff]   ;;  %v1042_v35 = vld [vmem:[%s1411_s3 + $0x74] ss:$8 sps:$4 sm:$0xff]   ;;  %v243_v52 = vand.u32 1, %v1290_v50 }
  0x11   : > { %285 = vrot.lane.b32.xlu0 %v1163_v6, %s1082_s9  ;;  %703 = vmatprep.subr.bf16.mxu1 %v1027_v19  ;;  %v341_v31 = vpack.c.bf16 %v1163_v6, %v1163_v6  ;;  %v1039_v33 = vld [vmem:[%s1411_s3 + $0x64] ss:$8 sps:$4 sm:$0xff]   ;;  %v1041_v34 = vld [vmem:[%s1411_s3 + $0x60] ss:$8 sps:$4 sm:$0xff]   ;;  %v1044_v36 = vld [vmem:[%s1411_s3 + $0x70] ss:$8 sps:$4 sm:$0xff]  }
  0x12   : > { %v1045_v37 = vld [vmem:[%s1411_s3 + $0x84] ss:$8 sps:$4 sm:$0xff]   ;;  %v1047_v38 = vld [vmem:[%s1411_s3 + $0x80] ss:$8 sps:$4 sm:$0xff]   ;;  %v1048_v39 = vld [vmem:[%s1411_s3 + $0x94] ss:$8 sps:$4 sm:$0xff]  }
  0x13   : > { %457 = vmatpush1.bf16.msra.mxu0 %v1008_v11  ;;  %v1050_v40 = vld [vmem:[%s1411_s3 + $0x90] ss:$8 sps:$4 sm:$0xff]   ;;  %v1051_v41 = vld [vmem:[%s1411_s3 + $0xa4] ss:$8 sps:$4 sm:$0xff]   ;;  %v1053_v42 = vld [vmem:[%s1411_s3 + $0xa0] ss:$8 sps:$4 sm:$0xff]  }
  0x14   : > { %458 = vmatprep.subr.bf16.mxu0 %v1009_v12  ;;  %704 = vmatpush1.bf16.msra.mxu1 %v1029_v22  ;;  %v1054_v43 = vld [vmem:[%s1411_s3 + $0xb4] ss:$8 sps:$4 sm:$0xff]   ;;  %v1056_v44 = vld [vmem:[%s1411_s3 + $0xb0] ss:$8 sps:$4 sm:$0xff]   ;;  %v1057_v45 = vld [vmem:[%s1411_s3 + $0xc4] ss:$8 sps:$4 sm:$0xff]  }
  0x15   : > { %283 = vrot.lane.b32.xlu0 %v1163_v6, %s1085_s14  ;;  %705 = vmatprep.subr.bf16.mxu1 %v1030_v23  ;;  %v1059_v46 = vld [vmem:[%s1411_s3 + $0xc0] ss:$8 sps:$4 sm:$0xff]   ;;  %v1060_v47 = vld [vmem:[%s1411_s3 + $0xd4] ss:$8 sps:$4 sm:$0xff]   ;;  %v1062_v51 = vld [vmem:[%s1411_s3 + $0xd0] ss:$8 sps:$4 sm:$0xff]  }
  0x16   : > { %vm225_vm1 = vcmp.lt.s32.totalorder %v1287_v49, 64  ;;  %v1063_v53 = vld [vmem:[%s1411_s3 + $0xe4] ss:$8 sps:$4 sm:$0xff]   ;;  %v1065_v54 = vld [vmem:[%s1411_s3 + $0xe0] ss:$8 sps:$4 sm:$0xff]   ;;  %vm1308_vm3 = vcmp.eq.s32.totalorder %v243_v52, 1 }
  0x17   : > { %459 = vmatpush1.bf16.msra.mxu0 %v1011_v15  ;;  %vm1304_vm2 = vmand %vm224_vm0, %vm225_vm1  ;;  %v1066_v57 = vld [vmem:[%s1411_s3 + $0xf4] ss:$8 sps:$4 sm:$0xff]   ;;  %v1068_v59 = vld [vmem:[%s1411_s3 + $0xf0] ss:$8 sps:$4 sm:$0xff]   ;;  %vm1323_vm5 = vcmp.eq.s32.totalorder %v243_v52, 0  ;;  %v1086_v1 = vmov 67  }
  0x18   : > { %460 = vmatprep.subr.bf16.mxu0 %v1012_v17  ;;  %706 = vmatpush1.bf16.msra.mxu1 %v1032_v26  ;;  %vm282_vm4 = vmand %vm1308_vm3, %vm1304_vm2  ;;  %s1087_s17 = smov 2   ;;  %s1088_s20 = smov 126   ;;  %v1089_v4 = vmov 66   ;;  %v361_v5 = vshrl.u32 %v222_v48, 7  ;;  %v255_v7 = vand.u32 3, %v1290_v50  ;;  %vm270_vm15 = vcmp.ge.s32.totalorder %v1290_v50, 4 }
  0x19   : > { %784 = vperm.xlu0 %988, %v1163_v6   ;;  %707 = vmatprep.subr.bf16.mxu1 %v1033_v27  ;;  %vm281_vm6 = vmand %vm1323_vm5, %vm1304_vm2  ;;  %v358_v9 = vld [vmem:[%s1410_s2] sm:$0x3]  ;;  %s1090_s25 = smov 32   ;;  %s1091_s26 = smov 96   ;;  %vm269_vm0 = vcmp.lt.s32.totalorder %v1290_v50, 4 }
  0x1a   : > { %v362_v8 = vsub.s32 0, %v361_v5  ;;  %v366_v11 = vsub.s32 1, %v361_v5  ;;  %vm266_vm7 = vcmp.ge.s32.totalorder %v255_v7, 2  ;;  %vm265_vm9 = vcmp.le.s32.totalorder %v255_v7, 1  ;;  %s1092_s27 = smov 4   ;;  %s1093_s29 = smov 64   ;;  %vm312_vm1 = vmand %vm270_vm15, %vm1304_vm2 }
  0x1b   : > { %461 = vmatpush1.bf16.msra.mxu0 %v1014_v20  ;;  %vm292_vm8 = vmand %vm266_vm7, %vm1304_vm2  ;;  %vm268_vm11 = vcmp.eq.s32.totalorder %v255_v7, 2  ;;  %vm267_vm13 = vcmp.eq.s32.totalorder %v255_v7, 1  ;;  %s1094_s30 = smov 124   ;;  %vm742_vm7 = vcmask 31744   ;;  %s1100_s6 = smov 72  }
  0x1c   : > { %462 = vmatprep.subr.bf16.mxu0 %v1015_v21  ;;  %708 = vmatpush1.bf16.msra.mxu1 %v1035_v29  ;;  %v363_v12 = vrot.slane %v358_v9, %v362_v8  ;;  %v367_v14 = vrot.slane %v358_v9, %v366_v11  ;;  %vm291_vm10 = vmand %vm265_vm9, %vm1304_vm2  ;;  %vm275_vm9 = vcmp.eq.s32.totalorder %v1290_v50, 5 }
  0x1d   : > { %709 = vmatprep.subr.bf16.mxu1 %v1036_v30  ;;  %991 = vset.pattern.permute.xlu0 %v1086_v1  ;;  %vm302_vm12 = vmand %vm268_vm11, %vm1304_vm2  ;;  %vm271_vm11 = vcmp.eq.s32.totalorder %v1290_v50, 2 }
  0x1e   : > { %vm301_vm14 = vmand %vm267_vm13, %vm1304_vm2 }
  0x1f   : > { %463 = vmatpush1.bf16.msra.mxu0 %v1017_v24 }
  0x20   : > { %464 = vmatprep.subr.bf16.mxu0 %v1018_v25  ;;  %710 = vmatpush1.bf16.msra.mxu1 %v1038_v32 }
  0x21   : > { %711 = vmatprep.subr.bf16.mxu1 %v1039_v33 }
  0x23   : > { %465 = vmatpush1.bf16.msra.mxu0 %v1020_v28 }
  0x24   : > { %712 = vmatpush1.bf16.msra.mxu1 %v1041_v34 }
  0x25   : > { %713 = vmatprep.subr.bf16.mxu1 %v1042_v35 }
  0x26   : > { %483 = vmatmul.mubr.bf16.vlgmr.msra.gmra.mrb[0].mxu0 %v341_v31  ;;  %v527_v31 = vld [vmem:[%s1412_s4] sm:$0x3] }
  0x27   : > { %v532_v33 = vrot.slane %v527_v31, %v362_v8 }
  0x28   : > { %714 = vmatpush1.bf16.msra.mxu1 %v1044_v36 }
  0x29   : > { %715 = vmatprep.subr.bf16.mxu1 %v1045_v37 }
  0x2c   : > { %716 = vmatpush1.bf16.msra.mxu1 %v1047_v38 }
  0x2d   : > { %717 = vmatprep.subr.bf16.mxu1 %v1048_v39 }
  0x30   : > { %718 = vmatpush1.bf16.msra.mxu1 %v1050_v40 }
  0x31   : > { %719 = vmatprep.subr.bf16.mxu1 %v1051_v41 }
  0x34   : > { %720 = vmatpush1.bf16.msra.mxu1 %v1053_v42 }
  0x35   : > { %721 = vmatprep.subr.bf16.mxu1 %v1054_v43 }
  0x38   : > { %722 = vmatpush1.bf16.msra.mxu1 %v1056_v44 }
  0x39   : > { %723 = vmatprep.subr.bf16.mxu1 %v1057_v45 }
  0x3c   : > { %724 = vmatpush1.bf16.msra.mxu1 %v1059_v46 }
  0x3d   : > { %725 = vmatprep.subr.bf16.mxu1 %v1060_v47 }
  0x40   : > { %726 = vmatpush1.bf16.msra.mxu1 %v1062_v51 }
  0x41   : > { %727 = vmatprep.subr.bf16.mxu1 %v1063_v53 }
  0x44   : > { %728 = vmatpush1.bf16.msra.mxu1 %v1065_v54 }
  0x45   : > { %729 = vmatprep.subr.bf16.mxu1 %v1066_v57 }
  0x48   : > { %730 = vmatpush1.bf16.msra.mxu1 %v1068_v59 }
  0x83   : > { %v286_v58 = vpop.permute.xlu0 %285 }
  0x84   : > { %v288_v60 = vmax.f32 %v1163_v6, %v286_v58 }
  0x86   : > { %v289_v62 = vsel %vm282_vm4, %v288_v60, %v1163_v6  ;;  %vm311_vm4 = vmand %vm269_vm0, %vm1304_vm2 }
  0x87   : > { %v284_v63 = vpop.permute.xlu0 %283 }
  0x88   : > { %v287_v0 = vmin.f32 %v1163_v6, %v284_v63 }
  0x8a   : > { %v290_v2 = vsel %vm281_vm6, %v287_v0, %v289_v62 }
  0x8b   : > { %295 = vrot.lane.b32.xlu1 %v290_v2, %s1087_s17 }
  0x8f   : > { %293 = vrot.lane.b32.xlu1 %v290_v2, %s1088_s20 }
  0x93   : > { %794 = vperm.xlu1 %989, %v1163_v6  }
  0x97   : > { %990 = vset.pattern.permute.xlu1 %v1089_v4 }
  0x98   : > { %804 = vperm.xlu1 %990, %v1163_v6   ;;  %v785_v30 = vpop.permute.xlu0 %784 }
  0x9c   : > { %992 = vset.pattern.permute.xlu1 %v1081_v3 }
  0xf9   : > { %v484_v16 = vpop.f32.mrb[0].mxu0 }
  0xfa   : > { %v485_v3 = vadd.f32 %v484_v16, %v363_v12  ;;  %v486_v17 = vpop.f32.mrb[1].mxu0 }
  0xfb   : > { %v487_v20 = vadd.f32 %v486_v17, %v367_v14  ;;  %v488_v21 = vpop.f32.mrb[2].mxu0  ;;  %v1095_v17 = vmov 1  }
  0xfc   : > { %v491_v22 = vmax.f32 %v485_v3, 0.0  ;;  %v489_v24 = vpop.f32.mrb[3].mxu0 }
  0xfd   : > { %v296_v13 = vpop.permute.xlu1 %295  ;;  %v492_v25 = vmax.f32 %v487_v20, 0.0 }
  0xfe   : > { %v298_v15 = vmax.f32 %v290_v2, %v296_v13  ;;  %v493_v28 = vpack.c.bf16 %v491_v22, %v491_v22 }
  0xff   : > { %v494_v27 = vpack.c.bf16 %v492_v25, %v492_v25 }
 0x100   : > { %v299_v18 = vsel %vm292_vm8, %v298_v15, %v290_v2  ;;  %vm274_vm8 = vcmp.eq.s32.totalorder %v1290_v50, 4 }
 0x101   : > { %v294_v19 = vpop.permute.xlu1 %293  ;;  %731 = vmatprep.mubr.bf16.mxu1 %v494_v27  ;;  %vm276_vm13 = vmor %vm274_vm8, %vm275_vm9 }
 0x102   : > { %v297_v23 = vmin.f32 %v290_v2, %v294_v19  ;;  %732 = vmatmul.mubr.bf16.vlgmr.msra.gmra.mrb[0].mxu1 %v493_v28  ;;  %vm322_vm15 = vmand %vm276_vm13, %vm1304_vm2 }
 0x104   : > { %v300_v26 = vsel %vm291_vm10, %v297_v23, %v299_v18  ;;  %vm834_vm10 = vcmask 261120  }
 0x105   : > { %303 = vrot.lane.b32.xlu1 %v300_v26, %s1085_s14  ;;  %305 = vrot.lane.b32.xlu0 %v300_v26, %s1082_s9 }
 0x109   : > { %814 = vperm.xlu0 %991, %v1163_v6   ;;  %v536_v6 = vrot.slane %v527_v31, %v366_v11  ;;  %v1097_v31 = vmov 3  }
 0x10d   : > { %993 = vset.pattern.permute.xlu0 %v1095_v17 }
 0x112   : > { %v795_v29 = vpop.permute.xlu1 %794 }
 0x117   : > { %v805_v32 = vpop.permute.xlu1 %804 }
 0x177   : > { %v306_v34 = vpop.permute.xlu0 %305  ;;  %v304_v39 = vpop.permute.xlu1 %303 }
 0x178   : > { %v308_v40 = vmax.f32 %v300_v26, %v306_v34  ;;  %v307_v45 = vmin.f32 %v300_v26, %v304_v39 }
 0x17a   : > { %v309_v46 = vsel %vm302_vm12, %v308_v40, %v300_v26  ;;  %vm272_vm12 = vcmp.eq.s32.totalorder %v1290_v50, 3 }
 0x17b   : > { %v310_v51 = vsel %vm301_vm14, %v307_v45, %v309_v46  ;;  %vm273_vm14 = vmor %vm271_vm11, %vm272_vm12 }
 0x17c   : > { %vm321_vm0 = vmand %vm273_vm14, %vm1304_vm2 }
 0x188   : > { %v815_v53 = vpop.permute.xlu0 %814 }
 0x1d5   : > { %v733_v35 = vpop.f32.mrb[0].mxu1 }
 0x1d6   : > { %v734_v36 = vadd.f32 %v733_v35, %v532_v33  ;;  %v735_v37 = vpop.f32.mrb[1].mxu1 }
 0x1d7   : > { %v737_v38 = vpop.f32.mrb[2].mxu1  ;;  %v1358_v47 = vadd.f32 %v735_v37, %v536_v6 }
 0x1d8   : > { %v740_v41 = vand.u32 2147483647, %v734_v36  ;;  %v738_v42 = vpop.f32.mrb[3].mxu1 }
 0x1d9   : > { %v1361_v52 = vand.u32 2147483647, %v1358_v47 }
 0x1da   : > { %v807_v43 = vmul.f32 %v805_v32, %v740_v41  ;;  %v787_v44 = vmul.f32 %v785_v30, %v740_v41  ;;  %v797_v48 = vmul.f32 %v795_v29, %v740_v41  ;;  %v817_v62 = vmul.f32 %v815_v53, %v740_v41 }
 0x1db   : > { %v743_v3 = vsel %vm742_vm7, %v1361_v52, 0.0  ;;  %v1096_v30 = vmov 2  }
 0x1dc   : > { %809 = vrot.lane.b32.xlu0 %v807_v43, %s1090_s25  ;;  %789 = vrot.lane.b32.xlu1 %v787_v44, %s1091_s26 }
 0x1e0   : > { %315 = vrot.lane.b32.xlu0 %v310_v51, %s1092_s27  ;;  %799 = vrot.lane.b32.xlu1 %v797_v48, %s1093_s29 }
 0x1e4   : > { %826 = vrot.lane.b32.xlu1 %v1361_v52, %s1093_s29 }
 0x1e8   : > { %313 = vrot.lane.b32.xlu1 %v310_v51, %s1094_s30 }
 0x24e   : > { %v790_v54 = vpop.permute.xlu1 %789  ;;  %v810_v57 = vpop.permute.xlu0 %809 }
 0x24f   : > { %v792_v58 = vadd.f32 %v790_v54, %v487_v20 }
 0x252   : > { %v800_v59 = vpop.permute.xlu1 %799  ;;  %v316_v63 = vpop.permute.xlu0 %315 }
 0x253   : > { %v802_v60 = vadd.f32 %v800_v59, %v792_v58  ;;  %v318_v4 = vmax.f32 %v310_v51, %v316_v63 }
 0x255   : > { %v812_v0 = vadd.f32 %v810_v57, %v802_v60  ;;  %v319_v11 = vsel %vm312_vm1, %v318_v4, %v310_v51  ;;  %vm279_vm1 = vcmp.ge.s32.totalorder %v1290_v50, 2 }
 0x256   : > { %v827_v1 = vpop.permute.xlu1 %826 }
 0x257   : > { %v818_v2 = vadd.f32 %v817_v62, %v812_v0 }
 0x259   : > { %v820_v5 = vmin.f32 %v818_v2, 0.0  ;;  %vm819_vm6 = vcmp.gt.f32.partialorder %v818_v2, 0.0 }
 0x25a   : > { %v314_v7 = vpop.permute.xlu1 %313 }
 0x25b   : > { %v821_v8 = vmul.f32 1.442695, %v820_v5  ;;  %v317_v9 = vmin.f32 %v310_v51, %v314_v7 }
 0x25d   : > { %1069 = vpow2.f32 %v821_v8  ;;  %v320_v12 = vsel %vm311_vm4, %v317_v9, %v319_v11  ;;  %vm277_vm4 = vcmp.lt.s32.totalorder %v1290_v50, 7 }
 0x25e   : > { %325 = vrot.lane.b32.xlu1 %v320_v12, %s1087_s17  ;;  %vm278_vm7 = vmand %vm1308_vm3, %vm277_vm4  ;;  %vm839_vm3 = vcmp.lt.s32.totalorder %v1287_v49, 8 }
 0x25f   : > { %vm331_vm9 = vmand %vm278_vm7, %vm1304_vm2 }
 0x267   : > { %v1070_v13 = vpop.eup %1069 }
 0x268   : > { %v957_v14 = vadd.f32 -1.0, %v1070_v13 }
 0x26a   : > { %v824_v15 = vsel %vm819_vm6, %v818_v2, %v957_v14  ;;  %vm280_vm6 = vmand %vm1323_vm5, %vm279_vm1 }
 0x26b   : > { %v829_v16 = vmul.f32 %v827_v1, %v824_v15  ;;  %vm332_vm8 = vmand %vm280_vm6, %vm1304_vm2  ;;  %vm840_vm2 = vcmp.eq.s32.totalorder %v1287_v49, 8 }
 0x26d   : > { %831 = vrot.lane.b32.xlu0 %v829_v16, %s1090_s25 }
 0x271   : > { %323 = vrot.lane.b32.xlu0 %v320_v12, %s1088_s20 }
 0x282   : > { %744 = vadd.xlane.f32.xlu1 %v743_v3 }
 0x2d0   : > { %v326_v18 = vpop.permute.xlu1 %325 }
 0x2d1   : > { %v328_v21 = vmax.f32 %v320_v12, %v326_v18 }
 0x2d3   : > { %v329_v24 = vsel %vm322_vm15, %v328_v21, %v320_v12 }
 0x2df   : > { %v832_v19 = vpop.permute.xlu0 %831 }
 0x2e0   : > { %v835_v20 = vsel %vm834_vm10, %v832_v19, 0.0 }
 0x2e1   : > { %836 = vadd.xlane.f32.xlu0 %v835_v20 }
 0x2e3   : > { %v324_v22 = vpop.permute.xlu0 %323 }
 0x2e4   : > { %v327_v23 = vmin.f32 %v320_v12, %v324_v22 }
 0x2e6   : > { %v330_v25 = vsel %vm321_vm0, %v327_v23, %v329_v24 }
 0x2e7   : > { %333 = vrot.lane.b32.xlu1 %v330_v25, %s1085_s14  ;;  %s1099_s14 = smov 80  }
 0x2f7   : > { %335 = vrot.lane.b32.xlu0 %v330_v25, %s1082_s9  ;;  %s1098_s9 = smov 88  }
 0x30f   : > { %v745_v26 = vpop.xlane.xlu1 %744 }
 0x310   : > { %v746_v27 = vmax.f32 %v745_v26, 1e-30 }
 0x312   : > { %1071 = vrcp.f32 %v746_v27 }
 0x31c   : > { %v1072_v28 = vpop.eup %1071 }
 0x31d   : > { %v748_v29 = vmul.f32 %v1072_v28, %v1361_v52 }
 0x31f   : > { %761 = vperm.xlu0 %993, %v748_v29   ;;  %753 = vperm.xlu1 %992, %v748_v29  }
 0x323   : > { %994 = vset.pattern.permute.xlu1 %v1096_v30  ;;  %996 = vset.pattern.permute.xlu0 %v1084_v10 }
 0x324   : > { %769 = vperm.xlu1 %994, %v748_v29  }
 0x328   : > { %995 = vset.pattern.permute.xlu1 %v1097_v31 }
 0x329   : > { %777 = vperm.xlu1 %995, %v748_v29  }
 0x359   : > { %v334_v33 = vpop.permute.xlu1 %333 }
 0x35a   : > { %v337_v35 = vmin.f32 %v330_v25, %v334_v33 }
 0x36e   : > { %v837_v32 = vpop.xlane.xlu0 %836 }
 0x36f   : > { %v838_v50 = vadd.f32 %v837_v32, %v1358_v47 }
 0x372   : > { %v336_v10 = vpop.permute.xlu0 %335 }
 0x373   : > { %v338_v34 = vmax.f32 %v330_v25, %v336_v10 }
 0x375   : > { %v339_v36 = vsel %vm332_vm8, %v338_v34, %v330_v25 }
 0x376   : > { %v340_v37 = vsel %vm331_vm9, %v337_v35, %v339_v36 }
 0x377   : > { %758 = vrot.lane.b32.xlu1 %v340_v37, %s1098_s9  ;;  %749 = vrot.lane.b32.xlu0 %v340_v37, %s1091_s26 }
 0x37b   : > { %766 = vrot.lane.b32.xlu1 %v340_v37, %s1099_s14  ;;  %843 = vperm.xlu0 %996, %v838_v50  }
 0x37f   : > { %774 = vrot.lane.b32.xlu1 %v340_v37, %s1100_s6 }
 0x39e   : > { %v754_v56 = vpop.permute.xlu1 %753  ;;  %v762_v39 = vpop.permute.xlu0 %761 }
 0x3a3   : > { %v770_v61 = vpop.permute.xlu1 %769 }
 0x3a8   : > { %v778_v38 = vpop.permute.xlu1 %777 }
 0x3e9   : > { %v759_v55 = vpop.permute.xlu1 %758  ;;  %v750_v41 = vpop.permute.xlu0 %749 }
 0x3ea   : > { %v756_v42 = vmul.f32 %v754_v56, %v750_v41  ;;  %v764_v6 = vmul.f32 %v762_v39, %v759_v55 }
 0x3ec   : > { %v765_v45 = vadd.f32 %v764_v6, %v756_v42 }
 0x3ed   : > { %v767_v40 = vpop.permute.xlu1 %766 }
 0x3ee   : > { %v772_v44 = vmul.f32 %v770_v61, %v767_v40 }
 0x3f0   : > { %v773_v47 = vadd.f32 %v772_v44, %v765_v45 }
 0x3f1   : > { %v775_v43 = vpop.permute.xlu1 %774 }
 0x3f2   : > { %v780_v46 = vmul.f32 %v778_v38, %v775_v43 }
 0x3f4   : > { %v781_v48 = vadd.f32 %v780_v46, %v773_v47 }
 0x3fa   : > { %v844_v51 = vpop.permute.xlu0 %843 }
 0x3fb   : > { %v846_v52 = vsel %vm840_vm2, %v844_v51, 0.0 }
 0x3fc   : > { %v847_v53 = vsel %vm839_vm3, %v781_v48, %v846_v52 }
 0x3fd   : > { %848 = vst [vmem:[%s219_s10] sm:$0xff] %v847_v53 }
 0x3fe PF: > { %s15_s18 = sadd.s32 1, %s1079_s18  }
 0x3ff   : > { %p12_p4 = scmp.ge.s32.totalorder %s15_s18, 4  }
 0x401   :  { %14 = sbr.rel (!%p12_p4) target bundleno = 1 (0x1), region = 70 }

</bundles_post_ra>
